<compile_context>
chip_gen: v7x
topology: tpu7x:2x2x1
jax: 0.10.0
libtpu: 0.0.40
codegen_flags: <defaults>
</compile_context>

<pallas_src>
import math

import numpy as np
import jax
import jax.numpy as jnp
from jax import lax
from jax.experimental import pallas as pl
from jax.experimental.pallas import tpu as pltpu  # noqa: F401

BATCH = 2
SEQ = 8
HIDDEN = 32
NUM_HEADS = 4
HEAD_SIZE = HIDDEN // NUM_HEADS
EPS = 1e-5          # layer_norm_epsilon
DROPOUT_P = 0.1     # eval-mode forward: dropout is identity

BS = BATCH * SEQ            # 16 folded (batch, seq) rows
NHBS = NUM_HEADS * BS       # 64 head-stacked rows used by the attention matmuls
LANES = 128                 # slab lane width (every item anchored at lane 0)

# ---- packed-slab row offsets (each item's row count is a multiple of 8) ----
R_WQ = 0                        # (H, H)    Q projection, pre-scaled by 1/sqrt(head_size)
R_WK = R_WQ + HIDDEN            # (H, H)
R_WV = R_WK + HIDDEN            # (H, H)
R_WO = R_WV + HIDDEN            # (H, H)
R_W1 = R_WO + HIDDEN            # (H, 4H)
R_W2 = R_W1 + HIDDEN            # (4H, H)
R_HMSK = R_W2 + 4 * HIDDEN      # (NHBS, H)  hmask[n*BS+t, f] = 1 iff feature f in head n
R_AMSK = R_HMSK + NHBS          # (NHBS, BS) causal + same-batch additive mask (0 / -1e4)
R_VEC = R_AMSK + NHBS           # 16 rows of (1, *) vectors, see V_* below
SLAB_ROWS = R_VEC + 16          # 432

# rows inside the vector block
V_LN1W, V_LN1B, V_BQ, V_BK, V_BV, V_BO, V_LN2W, V_LN2B, V_B2, V_B1 = range(10)


def _layer_norm(v, w, b):
    mu = jnp.mean(v, axis=-1, keepdims=True)
    var = jnp.mean((v - mu) ** 2, axis=-1, keepdims=True)
    return (v - mu) * lax.rsqrt(var + EPS) * w + b


def _gelu_exact(v):
    # torch.nn.functional.gelu default = exact (erf) gelu
    return 0.5 * v * (1.0 + lax.erf(v * (1.0 / math.sqrt(2.0))))


def gpt2_block_kernel(x_ref, slab_ref, out_ref):
    H, H4 = HIDDEN, 4 * HIDDEN

    def mat(r0, rows, cols):
        # Static sub-window of the packed slab: row offsets are 8-aligned and lanes
        # start at 0, so the load needs no lane rotation / relayout.
        return slab_ref[r0:r0 + rows, 0:cols]

    def vec(row, cols=HIDDEN):
        return slab_ref[R_VEC + row:R_VEC + row + 1, 0:cols]     # (1, cols)

    x = x_ref[...]                                               # (16, 32)

    # ---------------- attention branch: x + Wo @ attn(ln1(x)) ----------------
    xn1 = _layer_norm(x, vec(V_LN1W), vec(V_LN1B))
    q = jnp.dot(xn1, mat(R_WQ, H, H), preferred_element_type=jnp.float32) + vec(V_BQ)
    k = jnp.dot(xn1, mat(R_WK, H, H), preferred_element_type=jnp.float32) + vec(V_BK)
    v = jnp.dot(xn1, mat(R_WV, H, H), preferred_element_type=jnp.float32) + vec(V_BV)

    hmask = mat(R_HMSK, NHBS, H)                                 # (64, 32) head selector
    # Heads stacked on the sublane axis: row n*16+t of qbd is query t restricted to
    # head n's features (other lanes zeroed).  One sublane concat, no lane slicing.
    qbd = jnp.concatenate([q, q, q, q], axis=0) * hmask          # (64, 32)

    # scores[n*16+t, s] = (Q_n[t] . K_n[s]) / sqrt(head)   (scale pre-folded into Wq/bq)
    scores = lax.dot_general(qbd, k, (((1,), (1,)), ((), ())),
                             preferred_element_type=jnp.float32)  # (64, 16)
    scores = scores + mat(R_AMSK, NHBS, BS)                      # causal + same-batch mask
    # Raw logits are tiny and masked logits ~ -1e4 (exp underflows to exactly 0), so
    # softmax without max-subtraction is safe and matches the reference numerically.
    e = jnp.exp(scores)
    denom = jnp.sum(e, axis=-1, keepdims=True)                   # (64, 1)
    attn = e * pl.reciprocal(denom, approx=True)                 # EUP recip, ~2^-12 rel err

    # Per-head context for every feature, then head-select and collapse the 4 blocks
    # (aligned sublane slices + adds replace the old lane-axis concatenate).
    ctx_all = jnp.dot(attn, v, preferred_element_type=jnp.float32) * hmask   # (64, 32)
    ctx = (ctx_all[0:BS] + ctx_all[BS:2 * BS]
           + ctx_all[2 * BS:3 * BS] + ctx_all[3 * BS:4 * BS])                # (16, 32)

    x = x + jnp.dot(ctx, mat(R_WO, H, H), preferred_element_type=jnp.float32) + vec(V_BO)

    # ---------------- MLP branch: x + linear2(gelu(linear1(ln2(x)))) ----------------
    xn2 = _layer_norm(x, vec(V_LN2W), vec(V_LN2B))
    h1 = _gelu_exact(jnp.dot(xn2, mat(R_W1, H, H4), preferred_element_type=jnp.float32)
                     + vec(V_B1, H4))
    h2 = jnp.dot(h1, mat(R_W2, H4, H), preferred_element_type=jnp.float32) + vec(V_B2)
    # TODO(synk): nn.Dropout is identity in eval mode; train-mode parity would need
    # pltpu.prng_seed / prng_random_bits based dropout.
    out_ref[...] = x + h2


def pack_params(params):
    """One-time wrapper-side prep: fold the attention scale into Wq/bq, build the
    constant head/causal masks, and pack everything into one (SLAB_ROWS, 128) slab."""
    (ln1_w, ln1_b, wqkv, bqkv, wo, bo, ln2_w, ln2_b, w1, b1, w2, b2) = params
    H, hs, nh = HIDDEN, HEAD_SIZE, NUM_HEADS
    scale = 1.0 / math.sqrt(hs)

    # torch feature layout of attentionLL output is (three, num_heads, head_size):
    # columns [0:H] = Q, [H:2H] = K, [2H:3H] = V.
    wq = wqkv[:, 0:H] * scale
    wk = wqkv[:, H:2 * H]
    wv = wqkv[:, 2 * H:3 * H]
    bq = bqkv[:, 0:H] * scale
    bk = bqkv[:, H:2 * H]
    bv = bqkv[:, 2 * H:3 * H]

    # hmask[n*BS + t, f] = 1 iff feature f belongs to head n (used for Q and context).
    hmask = (np.arange(NHBS)[:, None] // BS == np.arange(H)[None, :] // hs)
    hmask = hmask.astype(np.float32)                                          # (64, 32)

    # Causal + same-batch additive mask over the folded (B*S) key axis, tiled once per
    # head along sublanes.  Masked logits end up ~-1e4, whose exp underflows to 0.
    idx = np.arange(BS)
    keep = (idx[None, :] <= idx[:, None]) & ((idx[None, :] // SEQ) == (idx[:, None] // SEQ))
    amask = np.tile(np.where(keep, 0.0, -10000.0).astype(np.float32), (nh, 1))  # (64, 16)

    vecs = jnp.zeros((16, LANES), jnp.float32)
    for row, val in ((V_LN1W, ln1_w), (V_LN1B, ln1_b), (V_BQ, bq), (V_BK, bk),
                     (V_BV, bv), (V_BO, bo), (V_LN2W, ln2_w), (V_LN2B, ln2_b),
                     (V_B2, b2), (V_B1, b1)):
        flat = jnp.asarray(val, jnp.float32).reshape(-1)
        vecs = vecs.at[row, 0:flat.shape[0]].set(flat)

    def pad(a):
        a = jnp.asarray(a, jnp.float32)
        return jnp.pad(a, ((0, 0), (0, LANES - a.shape[1])))

    slab = jnp.concatenate(
        [pad(wq), pad(wk), pad(wv), pad(wo), pad(w1), pad(w2),
         pad(hmask), pad(amask), vecs], axis=0)
    assert slab.shape == (SLAB_ROWS, LANES)
    return slab


def gpt2_block(x, slab):
    B, S, H = x.shape
    # Fold batch into the sublane axis: single grid-less invocation, all operands
    # resident in VMEM (~220 KiB), exactly 3 DMAs total (x, slab, out).
    out2d = pl.pallas_call(
        gpt2_block_kernel,
        out_shape=jax.ShapeDtypeStruct((B * S, H), jnp.float32),
    )(x.reshape(B * S, H), slab)
    return out2d.reshape(B, S, H)


def gpt2_block_ref(x, params):
    (ln1_w, ln1_b, wqkv, bqkv, wo, bo, ln2_w, ln2_b, w1, b1, w2, b2) = params
    B, S, H = x.shape
    nh, hs = NUM_HEADS, HEAD_SIZE

    xn = _layer_norm(x, ln1_w, ln1_b)
    kqv = xn @ wqkv + bqkv
    q = kqv[..., 0:H].reshape(B, S, nh, hs)
    k = kqv[..., H:2 * H].reshape(B, S, nh, hs)
    v = kqv[..., 2 * H:3 * H].reshape(B, S, nh, hs)
    scores = jnp.einsum('bsnh,btnh->bnst', k, q) / math.sqrt(hs)
    s_idx = jnp.arange(S)[:, None]
    t_idx = jnp.arange(S)[None, :]
    scores = jnp.where(t_idx >= s_idx, scores, -10000.0)
    m = jnp.max(scores, axis=2, keepdims=True)
    e = jnp.exp(scores - m)
    attn = e / jnp.sum(e, axis=2, keepdims=True)
    out = jnp.einsum('bnst,bsnh->btnh', attn, v).reshape(B, S, H)
    x = x + out @ wo + bo

    xn2 = _layer_norm(x, ln2_w, ln2_b)
    h1 = _gelu_exact(xn2 @ w1 + b1)
    h2 = h1 @ w2 + b2
    return x + h2


def init_params(key):
    H = HIDDEN
    ks = jax.random.split(key, 12)
    n = lambda k, shape, s=0.02: s * jax.random.normal(k, shape, jnp.float32)
    ln1_w = 1.0 + n(ks[0], (1, H), 0.01)
    ln1_b = n(ks[1], (1, H), 0.01)
    wqkv = n(ks[2], (H, 3 * H))        # attentionLL.weight.T  (in, out)
    bqkv = n(ks[3], (1, 3 * H))
    wo = n(ks[4], (H, H))              # outputLL.weight.T
    bo = n(ks[5], (1, H))
    ln2_w = 1.0 + n(ks[6], (1, H), 0.01)
    ln2_b = n(ks[7], (1, H), 0.01)
    w1 = n(ks[8], (H, 4 * H))          # linear1.weight.T
    b1 = n(ks[9], (1, 4 * H))
    w2 = n(ks[10], (4 * H, H))         # linear2.weight.T
    b2 = n(ks[11], (1, H))
    return (ln1_w, ln1_b, wqkv, bqkv, wo, bo, ln2_w, ln2_b, w1, b1, w2, b2)


if __name__ == "__main__":
    key = jax.random.PRNGKey(0)
    kx, kp = jax.random.split(key)
    x = jax.random.normal(kx, (BATCH, SEQ, HIDDEN), jnp.float32)
    params = init_params(kp)
    slab = pack_params(params)          # one-time parameter packing (outside the kernel)
    jax.block_until_ready(slab)

    out = gpt2_block(x, slab)
    jax.block_until_ready(out)

    ref = gpt2_block_ref(x, params)
    assert out.shape == (BATCH, SEQ, HIDDEN)
    err = float(jnp.max(jnp.abs(out - ref)))
    assert jnp.allclose(out, ref, atol=1e-3, rtol=1e-3), err
    print("KERNEL_OK")
</pallas_src>

<mosaic_0001>
module attributes {stable_mosaic.version = 11 : i64} {
  func.func @gpt2_block_kernel(%arg0: memref<16x32xf32, #tpu.memory_space<vmem>>, %arg1: memref<432x128xf32, #tpu.memory_space<vmem>>, %arg2: memref<16x32xf32, #tpu.memory_space<vmem>>) attributes {dimension_semantics = [], scalar_prefetch = 0 : i64, scratch_operands = 0 : i64, tpu.core_type = #tpu.core_type<tc>} {
    %c0 = arith.constant 0 : index
    %c0_0 = arith.constant 0 : index
    %0 = vector.load %arg0[%c0, %c0_0] : memref<16x32xf32, #tpu.memory_space<vmem>>, vector<16x32xf32>
    %c416 = arith.constant 416 : index
    %c0_1 = arith.constant 0 : index
    %1 = vector.load %arg1[%c416, %c0_1] : memref<432x128xf32, #tpu.memory_space<vmem>>, vector<1x32xf32>
    %c417 = arith.constant 417 : index
    %c0_2 = arith.constant 0 : index
    %2 = vector.load %arg1[%c417, %c0_2] : memref<432x128xf32, #tpu.memory_space<vmem>>, vector<1x32xf32>
    %cst = arith.constant dense<0.000000e+00> : vector<16xf32>
    %3 = vector.multi_reduction <add>, %0, %cst [1] : vector<16x32xf32> to vector<16xf32>
    %4 = vector.shape_cast %3 : vector<16xf32> to vector<16x1xf32>
    %cst_3 = arith.constant 3.200000e+01 : f32
    %5 = vector.broadcast %cst_3 : f32 to vector<16x1xf32>
    %6 = arith.divf %4, %5 : vector<16x1xf32>
    %7 = vector.broadcast %6 : vector<16x1xf32> to vector<16x32xf32>
    %8 = arith.subf %0, %7 : vector<16x32xf32>
    %9 = arith.mulf %8, %8 : vector<16x32xf32>
    %cst_4 = arith.constant dense<0.000000e+00> : vector<16xf32>
    %10 = vector.multi_reduction <add>, %9, %cst_4 [1] : vector<16x32xf32> to vector<16xf32>
    %11 = vector.shape_cast %10 : vector<16xf32> to vector<16x1xf32>
    %cst_5 = arith.constant 3.200000e+01 : f32
    %12 = vector.broadcast %cst_5 : f32 to vector<16x1xf32>
    %13 = arith.divf %11, %12 : vector<16x1xf32>
    %14 = vector.broadcast %6 : vector<16x1xf32> to vector<16x32xf32>
    %15 = arith.subf %0, %14 : vector<16x32xf32>
    %cst_6 = arith.constant 9.99999974E-6 : f32
    %16 = vector.broadcast %cst_6 : f32 to vector<16x1xf32>
    %17 = arith.addf %13, %16 : vector<16x1xf32>
    %18 = math.rsqrt %17 : vector<16x1xf32>
    %19 = vector.broadcast %18 : vector<16x1xf32> to vector<16x32xf32>
    %20 = arith.mulf %15, %19 : vector<16x32xf32>
    %21 = vector.broadcast %1 : vector<1x32xf32> to vector<16x32xf32>
    %22 = arith.mulf %20, %21 : vector<16x32xf32>
    %23 = vector.broadcast %2 : vector<1x32xf32> to vector<16x32xf32>
    %24 = arith.addf %22, %23 : vector<16x32xf32>
    %c0_7 = arith.constant 0 : index
    %c0_8 = arith.constant 0 : index
    %25 = vector.load %arg1[%c0_7, %c0_8] : memref<432x128xf32, #tpu.memory_space<vmem>>, vector<32x32xf32>
    %cst_9 = arith.constant dense<0.000000e+00> : vector<16x32xf32>
    %26 = tpu.matmul %24, %25, %cst_9 {dimension_numbers = #tpu.dot_dimension_numbers<[1], [0], [0], [1], [0, 0, 1, 1], [], []>} : vector<16x32xf32>, vector<32x32xf32>, vector<16x32xf32> -> vector<16x32xf32>
    %c418 = arith.constant 418 : index
    %c0_10 = arith.constant 0 : index
    %27 = vector.load %arg1[%c418, %c0_10] : memref<432x128xf32, #tpu.memory_space<vmem>>, vector<1x32xf32>
    %28 = vector.broadcast %27 : vector<1x32xf32> to vector<16x32xf32>
    %29 = arith.addf %26, %28 : vector<16x32xf32>
    %c32 = arith.constant 32 : index
    %c0_11 = arith.constant 0 : index
    %30 = vector.load %arg1[%c32, %c0_11] : memref<432x128xf32, #tpu.memory_space<vmem>>, vector<32x32xf32>
    %cst_12 = arith.constant dense<0.000000e+00> : vector<16x32xf32>
    %31 = tpu.matmul %24, %30, %cst_12 {dimension_numbers = #tpu.dot_dimension_numbers<[1], [0], [0], [1], [0, 0, 1, 1], [], []>} : vector<16x32xf32>, vector<32x32xf32>, vector<16x32xf32> -> vector<16x32xf32>
    %c419 = arith.constant 419 : index
    %c0_13 = arith.constant 0 : index
    %32 = vector.load %arg1[%c419, %c0_13] : memref<432x128xf32, #tpu.memory_space<vmem>>, vector<1x32xf32>
    %33 = vector.broadcast %32 : vector<1x32xf32> to vector<16x32xf32>
    %34 = arith.addf %31, %33 : vector<16x32xf32>
    %c64 = arith.constant 64 : index
    %c0_14 = arith.constant 0 : index
    %35 = vector.load %arg1[%c64, %c0_14] : memref<432x128xf32, #tpu.memory_space<vmem>>, vector<32x32xf32>
    %cst_15 = arith.constant dense<0.000000e+00> : vector<16x32xf32>
    %36 = tpu.matmul %24, %35, %cst_15 {dimension_numbers = #tpu.dot_dimension_numbers<[1], [0], [0], [1], [0, 0, 1, 1], [], []>} : vector<16x32xf32>, vector<32x32xf32>, vector<16x32xf32> -> vector<16x32xf32>
    %c420 = arith.constant 420 : index
    %c0_16 = arith.constant 0 : index
    %37 = vector.load %arg1[%c420, %c0_16] : memref<432x128xf32, #tpu.memory_space<vmem>>, vector<1x32xf32>
    %38 = vector.broadcast %37 : vector<1x32xf32> to vector<16x32xf32>
    %39 = arith.addf %36, %38 : vector<16x32xf32>
    %c288 = arith.constant 288 : index
    %c0_17 = arith.constant 0 : index
    %40 = vector.load %arg1[%c288, %c0_17] : memref<432x128xf32, #tpu.memory_space<vmem>>, vector<64x32xf32>
    %41 = tpu.concatenate %29, %29, %29, %29 in 0 : vector<16x32xf32>, vector<16x32xf32>, vector<16x32xf32>, vector<16x32xf32> -> vector<64x32xf32>
    %42 = arith.mulf %41, %40 : vector<64x32xf32>
    %cst_18 = arith.constant dense<0.000000e+00> : vector<64x16xf32>
    %43 = tpu.matmul %42, %34, %cst_18 {dimension_numbers = #tpu.dot_dimension_numbers<[1], [1], [0], [0], [0, 0, 1, 0], [], []>} : vector<64x32xf32>, vector<16x32xf32>, vector<64x16xf32> -> vector<64x16xf32>
    %c352 = arith.constant 352 : index
    %c0_19 = arith.constant 0 : index
    %44 = vector.load %arg1[%c352, %c0_19] : memref<432x128xf32, #tpu.memory_space<vmem>>, vector<64x16xf32>
    %45 = arith.addf %43, %44 : vector<64x16xf32>
    %46 = math.exp %45 : vector<64x16xf32>
    %cst_20 = arith.constant dense<0.000000e+00> : vector<64xf32>
    %47 = vector.multi_reduction <add>, %46, %cst_20 [1] : vector<64x16xf32> to vector<64xf32>
    %48 = vector.shape_cast %47 : vector<64xf32> to vector<64x1xf32>
    %49 = tpu.reciprocal %48 {approx = true} : vector<64x1xf32> -> vector<64x1xf32>
    %50 = vector.broadcast %49 : vector<64x1xf32> to vector<64x16xf32>
    %51 = arith.mulf %46, %50 : vector<64x16xf32>
    %cst_21 = arith.constant dense<0.000000e+00> : vector<64x32xf32>
    %52 = tpu.matmul %51, %39, %cst_21 {dimension_numbers = #tpu.dot_dimension_numbers<[1], [0], [0], [1], [0, 0, 1, 1], [], []>} : vector<64x16xf32>, vector<16x32xf32>, vector<64x32xf32> -> vector<64x32xf32>
    %53 = arith.mulf %52, %40 : vector<64x32xf32>
    %54 = vector.extract_strided_slice %53 {offsets = [0, 0], sizes = [16, 32], strides = [1, 1]} : vector<64x32xf32> to vector<16x32xf32>
    %55 = vector.extract_strided_slice %53 {offsets = [16, 0], sizes = [16, 32], strides = [1, 1]} : vector<64x32xf32> to vector<16x32xf32>
    %56 = arith.addf %54, %55 : vector<16x32xf32>
    %57 = vector.extract_strided_slice %53 {offsets = [32, 0], sizes = [16, 32], strides = [1, 1]} : vector<64x32xf32> to vector<16x32xf32>
    %58 = arith.addf %56, %57 : vector<16x32xf32>
    %59 = vector.extract_strided_slice %53 {offsets = [48, 0], sizes = [16, 32], strides = [1, 1]} : vector<64x32xf32> to vector<16x32xf32>
    %60 = arith.addf %58, %59 : vector<16x32xf32>
    %c96 = arith.constant 96 : index
    %c0_22 = arith.constant 0 : index
    %61 = vector.load %arg1[%c96, %c0_22] : memref<432x128xf32, #tpu.memory_space<vmem>>, vector<32x32xf32>
    %cst_23 = arith.constant dense<0.000000e+00> : vector<16x32xf32>
    %62 = tpu.matmul %60, %61, %cst_23 {dimension_numbers = #tpu.dot_dimension_numbers<[1], [0], [0], [1], [0, 0, 1, 1], [], []>} : vector<16x32xf32>, vector<32x32xf32>, vector<16x32xf32> -> vector<16x32xf32>
    %63 = arith.addf %0, %62 : vector<16x32xf32>
    %c421 = arith.constant 421 : index
    %c0_24 = arith.constant 0 : index
    %64 = vector.load %arg1[%c421, %c0_24] : memref<432x128xf32, #tpu.memory_space<vmem>>, vector<1x32xf32>
    %65 = vector.broadcast %64 : vector<1x32xf32> to vector<16x32xf32>
    %66 = arith.addf %63, %65 : vector<16x32xf32>
    %c422 = arith.constant 422 : index
    %c0_25 = arith.constant 0 : index
    %67 = vector.load %arg1[%c422, %c0_25] : memref<432x128xf32, #tpu.memory_space<vmem>>, vector<1x32xf32>
    %c423 = arith.constant 423 : index
    %c0_26 = arith.constant 0 : index
    %68 = vector.load %arg1[%c423, %c0_26] : memref<432x128xf32, #tpu.memory_space<vmem>>, vector<1x32xf32>
    %cst_27 = arith.constant dense<0.000000e+00> : vector<16xf32>
    %69 = vector.multi_reduction <add>, %66, %cst_27 [1] : vector<16x32xf32> to vector<16xf32>
    %70 = vector.shape_cast %69 : vector<16xf32> to vector<16x1xf32>
    %cst_28 = arith.constant 3.200000e+01 : f32
    %71 = vector.broadcast %cst_28 : f32 to vector<16x1xf32>
    %72 = arith.divf %70, %71 : vector<16x1xf32>
    %73 = vector.broadcast %72 : vector<16x1xf32> to vector<16x32xf32>
    %74 = arith.subf %66, %73 : vector<16x32xf32>
    %75 = arith.mulf %74, %74 : vector<16x32xf32>
    %cst_29 = arith.constant dense<0.000000e+00> : vector<16xf32>
    %76 = vector.multi_reduction <add>, %75, %cst_29 [1] : vector<16x32xf32> to vector<16xf32>
    %77 = vector.shape_cast %76 : vector<16xf32> to vector<16x1xf32>
    %cst_30 = arith.constant 3.200000e+01 : f32
    %78 = vector.broadcast %cst_30 : f32 to vector<16x1xf32>
    %79 = arith.divf %77, %78 : vector<16x1xf32>
    %80 = vector.broadcast %72 : vector<16x1xf32> to vector<16x32xf32>
    %81 = arith.subf %66, %80 : vector<16x32xf32>
    %cst_31 = arith.constant 9.99999974E-6 : f32
    %82 = vector.broadcast %cst_31 : f32 to vector<16x1xf32>
    %83 = arith.addf %79, %82 : vector<16x1xf32>
    %84 = math.rsqrt %83 : vector<16x1xf32>
    %85 = vector.broadcast %84 : vector<16x1xf32> to vector<16x32xf32>
    %86 = arith.mulf %81, %85 : vector<16x32xf32>
    %87 = vector.broadcast %67 : vector<1x32xf32> to vector<16x32xf32>
    %88 = arith.mulf %86, %87 : vector<16x32xf32>
    %89 = vector.broadcast %68 : vector<1x32xf32> to vector<16x32xf32>
    %90 = arith.addf %88, %89 : vector<16x32xf32>
    %c128 = arith.constant 128 : index
    %c0_32 = arith.constant 0 : index
    %91 = vector.load %arg1[%c128, %c0_32] : memref<432x128xf32, #tpu.memory_space<vmem>>, vector<32x128xf32>
    %cst_33 = arith.constant dense<0.000000e+00> : vector<16x128xf32>
    %92 = tpu.matmul %90, %91, %cst_33 {dimension_numbers = #tpu.dot_dimension_numbers<[1], [0], [0], [1], [0, 0, 1, 1], [], []>} : vector<16x32xf32>, vector<32x128xf32>, vector<16x128xf32> -> vector<16x128xf32>
    %c425 = arith.constant 425 : index
    %c0_34 = arith.constant 0 : index
    %93 = vector.load %arg1[%c425, %c0_34] : memref<432x128xf32, #tpu.memory_space<vmem>>, vector<1x128xf32>
    %94 = vector.broadcast %93 : vector<1x128xf32> to vector<16x128xf32>
    %95 = arith.addf %92, %94 : vector<16x128xf32>
    %cst_35 = arith.constant 5.000000e-01 : f32
    %96 = vector.broadcast %cst_35 : f32 to vector<16x128xf32>
    %97 = arith.mulf %96, %95 : vector<16x128xf32>
    %cst_36 = arith.constant 0.707106769 : f32
    %98 = vector.broadcast %cst_36 : f32 to vector<16x128xf32>
    %99 = arith.mulf %95, %98 : vector<16x128xf32>
    %100 = math.erf %99 : vector<16x128xf32>
    %cst_37 = arith.constant 1.000000e+00 : f32
    %101 = vector.broadcast %cst_37 : f32 to vector<16x128xf32>
    %102 = arith.addf %101, %100 : vector<16x128xf32>
    %103 = arith.mulf %97, %102 : vector<16x128xf32>
    %c160 = arith.constant 160 : index
    %c0_38 = arith.constant 0 : index
    %104 = vector.load %arg1[%c160, %c0_38] : memref<432x128xf32, #tpu.memory_space<vmem>>, vector<128x32xf32>
    %cst_39 = arith.constant dense<0.000000e+00> : vector<16x32xf32>
    %105 = tpu.matmul %103, %104, %cst_39 {dimension_numbers = #tpu.dot_dimension_numbers<[1], [0], [0], [1], [0, 0, 1, 1], [], []>} : vector<16x128xf32>, vector<128x32xf32>, vector<16x32xf32> -> vector<16x32xf32>
    %c424 = arith.constant 424 : index
    %c0_40 = arith.constant 0 : index
    %106 = vector.load %arg1[%c424, %c0_40] : memref<432x128xf32, #tpu.memory_space<vmem>>, vector<1x32xf32>
    %107 = vector.broadcast %106 : vector<1x32xf32> to vector<16x32xf32>
    %108 = arith.addf %105, %107 : vector<16x32xf32>
    %109 = arith.addf %66, %108 : vector<16x32xf32>
    %c0_41 = arith.constant 0 : index
    %c0_42 = arith.constant 0 : index
    %110 = vector.load %arg2[%c0_41, %c0_42] : memref<16x32xf32, #tpu.memory_space<vmem>>, vector<16x32xf32>
    tpu.vector_store %arg2[%c0_41, %c0_42], %109 {strides = array<i32>} : memref<16x32xf32, #tpu.memory_space<vmem>>, vector<16x32xf32>,
    return
  }
}

</mosaic_0001>

<bundles_post_ra>
// kernel: tpu_custom_call.1
= control target key start
LH: loop header
LB: loop body
LE: loop exit
PB: predicated region body
PF: predicated region fallthrough
CT: control target
= control target key end

     0   :  { %7 = vsyncpa [#allocation3], 0  ;;  %s1647_s0 = inlined_call_operand.hbm [shape: f32[16,32], index: 0, kind: input, shape index: {}]   ;;  %s1648_s1 = inlined_call_operand.hbm [shape: f32[432,128], index: 1, kind: input, shape index: {}]   ;;  %s1649_s2 = inlined_call_operand.hbm [shape: f32[16,32], index: 2, kind: output, shape index: {}]  }
   0x1   :  { %8 = vsyncpa [#allocation6], 0 }
   0x2   :  { %9 = vsyncpa [#allocation4], 0  ;;  %s1484_s9 = smov [#allocation2]   ;;  %s1412_s13 = scalar_lea.hbm %s1647_s0, 256 }
   0x3   :  { %s15_s10 = sshll.u32 %s1484_s9, 4  ;;  %p1413_p0 = scmp.ne.s32.totalorder %s1647_s0, %s1412_s13  ;;  %s16_s10 = int_to_ptr.vmem [resolvable:$true] %s15_s10 }
   0x4   :  { %p1416_p1 = scmp.lt.u32.totalorder %s1412_s13, %s1647_s0 }
   0x6   :  { %p1418_p2 = pnand %p1416_p1, %p1413_p0 }
   0x8   :  { %1421 = shalt.err (!%p1418_p2)
}
   0x9   :  { %s1422_s18 = scalar_lea.vmem %s16_s10, 256  ;;  %p1427_p4 = scmp.lt.s32.totalorder %s16_s10, %s16_s10 }
   0xa   :  { %p1423_p3 = scmp.ne.s32.totalorder %s16_s10, %s1422_s18  ;;  %p1428_p5 = scmp.lt.s32.totalorder %s1422_s18, %s1422_s18 }
   0xc   :  { %p1429_p6 = por %p1428_p5, %p1427_p4 }
   0xe   :  { %p1430_p7 = pnand %p1429_p6, %p1423_p3 }
  0x10   :  { %1433 = shalt.err (!%p1430_p7)
}
  0x11   :  { %s1485_s19 = smov 128   ;;  %s1486_s20 = smov 8  }
  0x12   :  { %21 = dma.hbm_to_vmem [thread:$0]  %s1647_s0, 256, %s16_s10, [#allocation3], %s1485_s19, %s1485_s19, %s1486_s20  }
  0x13   :  { %s1487_s23 = smov [#allocation5]   ;;  %s1434_s27 = scalar_lea.hbm %s1648_s1, 6912 }
  0x14   :  { %s27_s24 = sshll.u32 %s1487_s23, 4  ;;  %p1435_p8 = scmp.ne.s32.totalorder %s1648_s1, %s1434_s27  ;;  %s28_s24 = int_to_ptr.vmem [resolvable:$true] %s27_s24 }
  0x15   :  { %p1438_p9 = scmp.lt.u32.totalorder %s1434_s27, %s1648_s1 }
  0x17   :  { %p1440_p10 = pnand %p1438_p9, %p1435_p8 }
  0x19   :  { %1443 = shalt.err (!%p1440_p10)
}
  0x1a   :  { %s1444_s4 = scalar_lea.vmem %s28_s24, 6912  ;;  %p1449_p12 = scmp.lt.s32.totalorder %s28_s24, %s28_s24 }
  0x1b   :  { %p1445_p11 = scmp.ne.s32.totalorder %s28_s24, %s1444_s4  ;;  %p1450_p13 = scmp.lt.s32.totalorder %s1444_s4, %s1444_s4 }
  0x1d   :  { %p1451_p0 = por %p1450_p13, %p1449_p12 }
  0x1f   :  { %p1452_p1 = pnand %p1451_p0, %p1445_p11 }
  0x21   :  { %1455 = shalt.err (!%p1452_p1)
}
  0x22   :  { %33 = dma.hbm_to_vmem [thread:$0]  %s1648_s1, 6912, %s28_s24, [#allocation6], %s1485_s19, %s1485_s19, %s1486_s20  }
  0x23   :  { %1478 = dma.done.wait [#allocation3], 256  }
  0x24   :  { %1479 = vsyncadd [#allocation3], 4294967040 }
  0x25   :  { %1480 = dma.done.wait [#allocation6], 6912  }
  0x26   :  { %1481 = vsyncadd [#allocation6], 4294960384  ;;  %vm44_vm0 = vcmask 261120   ;;  %v1534_v0 = vld [vmem:[#allocation2] sm:$0xff]  ;;  %v1536_v1 = vld [vmem:[#allocation2 + $0x8] sm:$0xff]  ;;  %vm517_vm2 = vcmask 130048  }
  0x27   :  { %v45_v2 = vsel %vm44_vm0, %v1534_v0, 0.0  ;;  %v48_v3 = vsel %vm44_vm0, %v1536_v1, 0.0  ;;  %v84_v14 = vld [vmem:[#allocation5] sm:$0xff]  ;;  %v85_v15 = vld [vmem:[#allocation5 + $0x8] sm:$0xff]  ;;  %v86_v19 = vld [vmem:[#allocation5 + $0x10] sm:$0xff]  ;;  %s1488_s1 = smov [#allocation7]  }
  0x28   :  { %46 = vadd.xlane.f32.xlu0 %v45_v2  ;;  %v174_v16 = vld [vmem:[#allocation5 + $0x20] sm:$0xff]  ;;  %v1281_v17 = vpack.c.bf16 %v85_v15, %v84_v14  ;;  %v175_v18 = vld [vmem:[#allocation5 + $0x28] sm:$0xff]  ;;  %v87_v20 = vld [vmem:[#allocation5 + $0x18] sm:$0xff]  ;;  %s1040_s6 = sshll.u32 %s1488_s1, 4  ;;  %s1041_s6 = int_to_ptr.vmem [resolvable:$true] %s1040_s6 }
  0x29   :  { %v1289_v21 = vpack.c.bf16 %v175_v18, %v174_v16  ;;  %v1285_v22 = vpack.c.bf16 %v87_v20, %v86_v19  ;;  %v176_v23 = vld [vmem:[#allocation5 + $0x30] sm:$0xff]  ;;  %v177_v24 = vld [vmem:[#allocation5 + $0x38] sm:$0xff]  ;;  %v258_v26 = vld [vmem:[#allocation5 + $0x40] sm:$0xff]  ;;  %s1456_s7 = scalar_lea.vmem %s1041_s6, 256  ;;  %p1461_p3 = scmp.lt.s32.totalorder %s1041_s6, %s1041_s6 }
  0x2a   :  { %1282 = vmatprep.subr.bf16.mxu0 %v1281_v17  ;;  %v1293_v25 = vpack.c.bf16 %v177_v24, %v176_v23  ;;  %v259_v27 = vld [vmem:[#allocation5 + $0x48] sm:$0xff]  ;;  %v1053_v36 = vld [vmem:[#allocation5 + $0x1a0] ss:$0 sm:$0xff]  ;;  %v1054_v38 = vld [vmem:[#allocation5 + $0x1a1] ss:$0 sm:$0xff]  ;;  %p1457_p2 = scmp.ne.s32.totalorder %s1041_s6, %s1456_s7  ;;  %p1462_p4 = scmp.lt.s32.totalorder %s1456_s7, %s1456_s7 }
  0x2b   :  { %1284 = vmatpush3.bf16.msra.mxu0 %v1281_v17  ;;  %1290 = vmatprep.subr.bf16.mxu1 %v1289_v21  ;;  %v1297_v28 = vpack.c.bf16 %v259_v27, %v258_v26  ;;  %v260_v43 = vld [vmem:[#allocation5 + $0x50] sm:$0xff]  ;;  %v261_v44 = vld [vmem:[#allocation5 + $0x58] sm:$0xff]  ;;  %v1058_v48 = vld [vmem:[#allocation5 + $0x1a3] ss:$0 sm:$0xff] }
  0x2c   :  { %49 = vadd.xlane.f32.xlu0 %v48_v3  ;;  %1292 = vmatpush3.bf16.msra.mxu1 %v1289_v21  ;;  %v1301_v47 = vpack.c.bf16 %v261_v44, %v260_v43  ;;  %v1055_v49 = vld [vmem:[#allocation5 + $0x1a2] ss:$0 sm:$0xff]  ;;  %vm1306_vm1 = vmpackc.low %vm44_vm0, %vm44_vm0  ;;  %v1061_v60 = vld [vmem:[#allocation5 + $0x1a4] ss:$0 sm:$0xff]  ;;  %p1463_p5 = por %p1462_p4, %p1461_p3 }
  0x2d   :  { %1286 = vmatprep.subr.bf16.mxu0 %v1285_v22  ;;  %1294 = vmatprep.subr.bf16.mxu1 %v1293_v25  ;;  %v1552_v55 = vld [vmem:[#allocation5 + $0x120] sm:$0xff]  ;;  %v1558_v63 = vld [vmem:[#allocation5 + $0x128] sm:$0xff]  ;;  %v1575_v14 = vld [vmem:[#allocation5 + $0x150] sm:$0xff] }
  0x2e   :  { %v1580_v17 = vld [vmem:[#allocation5 + $0x158] sm:$0xff]  ;;  %v359_v19 = vld [vmem:[#allocation5 + $0x168] sm:$0xff]  ;;  %v358_v20 = vld [vmem:[#allocation5 + $0x160] sm:$0xff]  ;;  %p1464_p6 = pnand %p1463_p5, %p1457_p2 }
  0x2f   :  { %1288 = vmatpush3.bf16.msra.mxu0 %v1285_v22  ;;  %v360_v27 = vld [vmem:[#allocation5 + $0x170] sm:$0xff] }
  0x30   :  { %1296 = vmatpush3.bf16.msra.mxu1 %v1293_v25  ;;  %1298 = vmatprep.subr.bf16.mxu0 %v1297_v28  ;;  %v361_v25 = vld [vmem:[#allocation5 + $0x178] sm:$0xff]  ;;  %v364_v43 = vld [vmem:[#allocation5 + $0x190] sm:$0xff] }
  0xb5   :  { %v47_v4 = vpop.xlane.xlu0 %46 }
  0xb6   :  { %v52_v5 = vmul.f32 0.03125, %v47_v4 }
  0xb8   :  { %v54_v6 = vsub.f32 %v1534_v0, %v52_v5  ;;  %v1560_v5 = vld [vmem:[#allocation5 + $0x130] sm:$0xff] }
  0xb9   :  { %v50_v7 = vpop.xlane.xlu0 %49 }
  0xba   :  { %v53_v8 = vmul.f32 0.03125, %v50_v7  ;;  %v56_v9 = vmul.f32 %v54_v6, %v54_v6 }
  0xbc   :  { %v55_v10 = vsub.f32 %v1536_v1, %v53_v8  ;;  %v58_v11 = vsel %vm44_vm0, %v56_v9, 0.0  ;;  %v1564_v9 = vld [vmem:[#allocation5 + $0x138] sm:$0xff] }
  0xbd   :  { %59 = vadd.xlane.f32.xlu1 %v58_v11 }
  0xbe   :  { %v57_v12 = vmul.f32 %v55_v10, %v55_v10 }
  0xc0   :  { %v61_v13 = vsel %vm44_vm0, %v57_v12, 0.0 }
  0xc1   :  { %62 = vadd.xlane.f32.xlu1 %v61_v13  ;;  %v1572_v13 = vld [vmem:[#allocation5 + $0x148] sm:$0xff] }
 0x14a   :  { %v60_v29 = vpop.xlane.xlu1 %59 }
 0x14b   :  { %v64_v30 = vmul.f32 0.03125, %v60_v29 }
 0x14d   :  { %v66_v31 = vadd.f32 1e-05, %v64_v30 }
 0x14e   :  { %v63_v32 = vpop.xlane.xlu1 %62 }
 0x14f   :  { %1368 = vrsqrt.f32 %v66_v31  ;;  %v65_v33 = vmul.f32 0.03125, %v63_v32 }
 0x151   :  { %v67_v34 = vadd.f32 1e-05, %v65_v33  ;;  %v363_v33 = vld [vmem:[#allocation5 + $0x188] sm:$0xff] }
 0x153   :  { %1370 = vrsqrt.f32 %v67_v34 }
 0x159   :  { %v1369_v35 = vpop.eup %1368 }
 0x15a   :  { %v70_v37 = vmul.f32 %v1369_v35, %v54_v6  ;;  %v362_v35 = vld [vmem:[#allocation5 + $0x180] sm:$0xff] }
 0x15c   :  { %v76_v39 = vmul.f32 %v1053_v36, %v70_v37 }
 0x15d   :  { %v1371_v40 = vpop.eup %1370 }
 0x15e   :  { %v71_v41 = vmul.f32 %v1371_v40, %v55_v10  ;;  %v82_v42 = vadd.f32 %v1054_v38, %v76_v39  ;;  %v1567_v10 = vld [vmem:[#allocation5 + $0x140] sm:$0xff] }
 0x160   :  { %v77_v45 = vmul.f32 %v1053_v36, %v71_v41  ;;  %1167 = vmatprep.mubr.msk.f32.mxu0 %vm44_vm0, %v82_v42  ;;  %1178 = vmatprep.mubr.msk.f32.mxu1 %vm44_vm0, %v82_v42  ;;  %v365_v41 = vld [vmem:[#allocation5 + $0x198] sm:$0xff] }
 0x162   :  { %v83_v46 = vadd.f32 %v1054_v38, %v77_v45 }
 0x164   :  { %1168 = vmatmul.mubr.msk.f32.vlgmr.msra.gmra.mrb[0].mxu0 %vm44_vm0, %v83_v46  ;;  %1179 = vmatmul.mubr.msk.f32.vlgmr.msra.gmra.mrb[0].mxu1 %vm44_vm0, %v83_v46 }
 0x165   :  { %1300 = vmatpush3.bf16.msra.mxu0 %v1297_v28  ;;  %1189 = vmatprep.mubr.msk.f32.mxu0 %vm44_vm0, %v82_v42 }
 0x166   :  { %1302 = vmatprep.subr.bf16.mxu0 %v1301_v47 }
 0x169   :  { %1304 = vmatpush3.bf16.msra.mxu0 %v1301_v47 }
 0x16c   :  { %1190 = vmatmul.mubr.msk.f32.vlgmr.msra.gmra.mrb[2].mxu0 %vm44_vm0, %v83_v46 }
 0x237   :  { %v1169_v50 = vpop.f32.mrb[0].mxu0  ;;  %v1180_v51 = vpop.f32.mrb[0].mxu1 }
 0x238   :  { %v255_v52 = vadd.f32 %v1180_v51, %v1058_v48  ;;  %v165_v53 = vpop.f32.mrb[1].mxu0  ;;  %v249_v54 = vpop.f32.mrb[1].mxu1  ;;  %v171_v61 = vadd.f32 %v1169_v50, %v1055_v49 }
 0x239   :  { %v166_v56 = vadd.f32 %v1055_v49, %v165_v53  ;;  %v250_v57 = vadd.f32 %v1058_v48, %v249_v54 }
 0x23a   :  { %v351_v6 = vmul.f32 %v1558_v63, %v171_v61  ;;  %v353_v11 = vmul.f32 %v1564_v9, %v171_v61  ;;  %v355_v15 = vmul.f32 %v1572_v13, %v171_v61  ;;  %v357_v18 = vmul.f32 %v1580_v17, %v171_v61 }
 0x23b   :  { %v1305_v58 = vpack.c.bf16 %v255_v52, %v250_v57  ;;  %v350_v59 = vmul.f32 %v1552_v55, %v166_v56  ;;  %v352_v8 = vmul.f32 %v1560_v5, %v166_v56  ;;  %v354_v12 = vmul.f32 %v1567_v10, %v166_v56 }
 0x23c   :  { %v356_v16 = vmul.f32 %v1575_v14, %v166_v56 }
 0x23d   :  { %1307 = vmatprep.subr.msk.bf16.mxu1 %vm1306_vm1, %v1305_v58  ;;  %1196 = vmatprep.mubr.msk.f32.mxu1 %vm44_vm0, %v350_v59 }
 0x23e   :  { %1310 = vmatpush3.bf16.xpose.msk.msra.mxu1 %vm1306_vm1, %v1305_v58 }
 0x23f   :  { %v1191_v62 = vpop.f32.mrb[2].mxu0 }
 0x240   :  { %v339_v2 = vadd.f32 %v1191_v62, %v1061_v60  ;;  %v333_v3 = vpop.f32.mrb[3].mxu0 }
 0x241   :  { %v334_v4 = vadd.f32 %v1061_v60, %v333_v3 }
 0x243   :  { %v1311_v7 = vpack.c.bf16 %v339_v2, %v334_v4 }
 0x245   :  { %1312 = vmatprep.subr.bf16.mxu0 %v1311_v7  ;;  %1197 = vmatmul.mubr.msk.f32.vlgmr.msra.gmra.mrb[2].mxu1 %vm44_vm0, %v351_v6 }
 0x246   :  { %1314 = vmatpush3.bf16.msra.mxu0 %v1311_v7  ;;  %1199 = vmatprep.mubr.msk.f32.mxu1 %vm44_vm0, %v352_v8 }
 0x249   :  { %1200 = vmatmul.mubr.msk.f32.gmra.mrb[4].mxu1 %vm44_vm0, %v353_v11 }
 0x24a   :  { %1202 = vmatprep.mubr.msk.f32.mxu1 %vm44_vm0, %v354_v12 }
 0x24d   :  { %1203 = vmatmul.mubr.msk.f32.gmra.mrb[6].mxu1 %vm44_vm0, %v355_v15 }
 0x24e   :  { %1205 = vmatprep.mubr.msk.f32.mxu1 %vm44_vm0, %v356_v16 }
 0x251   :  { %1206 = vmatmul.mubr.msk.f32.gmra.mrb[8].mxu1 %vm44_vm0, %v357_v18 }
 0x318   :  { %v1198_v21 = vpop.f32.mrb[2].mxu1 }
 0x319   :  { %v468_v22 = vadd.f32 %v1198_v21, %v359_v19  ;;  %v462_v23 = vpop.f32.mrb[3].mxu1 }
 0x31a   :  { %v463_v24 = vadd.f32 %v462_v23, %v358_v20 }
 0x31b   :  { %v503_v26 = vmul.f32 1.442695, %v468_v22 }
 0x31c   :  { %v501_v28 = vmul.f32 1.442695, %v463_v24  ;;  %v1201_v29 = vpop.f32.mrb[4].mxu1 }
 0x31d   :  { %1372 = vpow2.f32 %v503_v26  ;;  %v478_v30 = vadd.f32 %v1201_v29, %v361_v25  ;;  %v472_v31 = vpop.f32.mrb[5].mxu1 }
 0x31e   :  { %1374 = vpow2.f32 %v501_v28  ;;  %v473_v32 = vadd.f32 %v472_v31, %v360_v27 }
 0x31f   :  { %v507_v34 = vmul.f32 1.442695, %v478_v30 }
 0x320   :  { %v505_v36 = vmul.f32 1.442695, %v473_v32  ;;  %v1204_v37 = vpop.f32.mrb[6].mxu1 }
 0x321   :  { %1376 = vpow2.f32 %v507_v34  ;;  %v488_v38 = vadd.f32 %v1204_v37, %v363_v33  ;;  %v482_v39 = vpop.f32.mrb[7].mxu1  ;;  %v701_v37 = vld [vmem:[#allocation5 + $0x60] sm:$0xff] }
 0x322   :  { %1378 = vpow2.f32 %v505_v36  ;;  %v483_v40 = vadd.f32 %v482_v39, %v362_v35 }
 0x323   :  { %v511_v42 = vmul.f32 1.442695, %v488_v38  ;;  %v702_v38 = vld [vmem:[#allocation5 + $0x68] sm:$0xff] }
 0x324   :  { %v509_v44 = vmul.f32 1.442695, %v483_v40  ;;  %v1207_v45 = vpop.f32.mrb[8].mxu1  ;;  %v1315_v39 = vpack.c.bf16 %v702_v38, %v701_v37  ;;  %v703_v40 = vld [vmem:[#allocation5 + $0x70] sm:$0xff] }
 0x325   :  { %1380 = vpow2.f32 %v511_v42  ;;  %v498_v46 = vadd.f32 %v1207_v45, %v365_v41  ;;  %v492_v47 = vpop.f32.mrb[9].mxu1  ;;  %v704_v41 = vld [vmem:[#allocation5 + $0x78] sm:$0xff] }
 0x326   :  { %1382 = vpow2.f32 %v509_v44  ;;  %v493_v48 = vadd.f32 %v492_v47, %v364_v43  ;;  %1316 = vmatprep.subr.bf16.mxu0 %v1315_v39  ;;  %v1319_v42 = vpack.c.bf16 %v704_v41, %v703_v40 }
 0x327   :  { %v1373_v49 = vpop.eup %1372  ;;  %v515_v50 = vmul.f32 1.442695, %v498_v46 }
 0x328   :  { %v1375_v51 = vpop.eup %1374  ;;  %v513_v52 = vmul.f32 1.442695, %v493_v48  ;;  %v521_v53 = vsel %vm517_vm2, %v1373_v49, 0.0 }
 0x329   :  { %1384 = vpow2.f32 %v515_v50  ;;  %522 = vadd.xlane.f32.xlu1 %v521_v53  ;;  %v518_v54 = vsel %vm517_vm2, %v1375_v51, 0.0 }
 0x32a   :  { %1386 = vpow2.f32 %v513_v52  ;;  %519 = vadd.xlane.f32.xlu0 %v518_v54 }
 0x32b   :  { %v1377_v56 = vpop.eup %1376 }
 0x32c   :  { %v1379_v57 = vpop.eup %1378  ;;  %v527_v58 = vsel %vm517_vm2, %v1377_v56, 0.0 }
 0x32d   :  { %528 = vadd.xlane.f32.xlu1 %v527_v58  ;;  %v524_v59 = vsel %vm517_vm2, %v1379_v57, 0.0 }
 0x32e   :  { %525 = vadd.xlane.f32.xlu0 %v524_v59 }
 0x32f   :  { %v1381_v60 = vpop.eup %1380 }
 0x330   :  { %v1383_v61 = vpop.eup %1382  ;;  %v533_v62 = vsel %vm517_vm2, %v1381_v60, 0.0 }
 0x331   :  { %534 = vadd.xlane.f32.xlu1 %v533_v62  ;;  %v530_v2 = vsel %vm517_vm2, %v1383_v61, 0.0 }
 0x332   :  { %531 = vadd.xlane.f32.xlu0 %v530_v2  ;;  %v1084_v2 = vld [vmem:[#allocation5 + $0x1a5] ss:$0 sm:$0xff] }
 0x333   :  { %v1385_v3 = vpop.eup %1384 }
 0x334   :  { %v1387_v4 = vpop.eup %1386  ;;  %v539_v6 = vsel %vm517_vm2, %v1385_v3, 0.0 }
 0x335   :  { %540 = vadd.xlane.f32.xlu1 %v539_v6  ;;  %v536_v7 = vsel %vm517_vm2, %v1387_v4, 0.0 }
 0x336   :  { %537 = vadd.xlane.f32.xlu0 %v536_v7 }
 0x3b6   :  { %v523_v8 = vpop.xlane.xlu1 %522 }
 0x3b7   :  { %1388 = vrcp.f32 %v523_v8  ;;  %v520_v11 = vpop.xlane.xlu0 %519 }
 0x3b8   :  { %1390 = vrcp.f32 %v520_v11 }
 0x3ba   :  { %v529_v12 = vpop.xlane.xlu1 %528 }
 0x3bb   :  { %1392 = vrcp.f32 %v529_v12  ;;  %v526_v15 = vpop.xlane.xlu0 %525 }
 0x3bc   :  { %1394 = vrcp.f32 %v526_v15 }
 0x3be   :  { %v535_v16 = vpop.xlane.xlu1 %534 }
 0x3bf   :  { %1396 = vrcp.f32 %v535_v16  ;;  %v532_v18 = vpop.xlane.xlu0 %531 }
 0x3c0   :  { %1398 = vrcp.f32 %v532_v18 }
 0x3c1   :  { %v1389_v19 = vpop.eup %1388 }
 0x3c2   :  { %v1391_v20 = vpop.eup %1390  ;;  %v541_v21 = vpop.xlane.xlu1 %540  ;;  %v551_v24 = vmul.f32 %v1389_v19, %v1373_v49 }
 0x3c3   :  { %1400 = vrcp.f32 %v541_v21  ;;  %v538_v22 = vpop.xlane.xlu0 %537  ;;  %v550_v23 = vmul.f32 %v1391_v20, %v1375_v51  ;;  %v835_v20 = vld [vmem:[#allocation5 + $0x80] sm:$0xff]  ;;  %v836_v21 = vld [vmem:[#allocation5 + $0x88] sm:$0xff] }
 0x3c4   :  { %1402 = vrcp.f32 %v538_v22  ;;  %v1323_v22 = vpack.c.bf16 %v836_v21, %v835_v20 }
 0x3c5   :  { %v1393_v25 = vpop.eup %1392  ;;  %1212 = vmatprep.mubr.msk.f32.mxu0 %vm517_vm2, %v550_v23  ;;  %v837_v23 = vld [vmem:[#allocation5 + $0x90] sm:$0xff] }
 0x3c6   :  { %v1395_v26 = vpop.eup %1394  ;;  %1213 = vmatmul.mubr.msk.f32.vlgmr.msra.gmra.mrb[4].mxu0 %vm517_vm2, %v551_v24  ;;  %v553_v28 = vmul.f32 %v1393_v25, %v1377_v56  ;;  %v838_v24 = vld [vmem:[#allocation5 + $0x98] sm:$0xff] }
 0x3c7   :  { %v552_v27 = vmul.f32 %v1395_v26, %v1379_v57  ;;  %1318 = vmatpush3.bf16.msra.mxu0 %v1315_v39  ;;  %v1327_v25 = vpack.c.bf16 %v838_v24, %v837_v23  ;;  %v935_v26 = vld [vmem:[#allocation5 + $0xa0] sm:$0xff] }
 0x3c8   :  { %1320 = vmatprep.subr.bf16.mxu0 %v1319_v42 }
 0x3c9   :  { %v1397_v29 = vpop.eup %1396  ;;  %1215 = vmatprep.mubr.msk.f32.mxu0 %vm517_vm2, %v552_v27  ;;  %v936_v27 = vld [vmem:[#allocation5 + $0xa8] sm:$0xff] }
 0x3ca   :  { %v1399_v30 = vpop.eup %1398  ;;  %1216 = vmatmul.mubr.msk.f32.gmra.mrb[6].mxu0 %vm517_vm2, %v553_v28  ;;  %v555_v32 = vmul.f32 %v1397_v29, %v1381_v60  ;;  %v937_v28 = vld [vmem:[#allocation5 + $0xb0] sm:$0xff]  ;;  %v1331_v29 = vpack.c.bf16 %v936_v27, %v935_v26 }
 0x3cb   :  { %v554_v31 = vmul.f32 %v1399_v30, %v1383_v61  ;;  %1322 = vmatpush3.bf16.msra.mxu0 %v1319_v42  ;;  %v938_v30 = vld [vmem:[#allocation5 + $0xb8] sm:$0xff]  ;;  %v1085_v42 = vld [vmem:[#allocation5 + $0x1a6] ss:$0 sm:$0xff] }
 0x3cc   :  { %1324 = vmatprep.subr.bf16.mxu0 %v1323_v22  ;;  %1332 = vmatprep.subr.bf16.mxu1 %v1331_v29 }
 0x3cd   :  { %v1401_v33 = vpop.eup %1400  ;;  %1218 = vmatprep.mubr.msk.f32.mxu0 %vm517_vm2, %v554_v31  ;;  %v1335_v31 = vpack.c.bf16 %v938_v30, %v937_v28  ;;  %1334 = vmatpush3.bf16.msra.mxu1 %v1331_v29 }
 0x3ce   :  { %v1403_v34 = vpop.eup %1402  ;;  %1219 = vmatmul.mubr.msk.f32.gmra.mrb[8].mxu0 %vm517_vm2, %v555_v32  ;;  %v557_v36 = vmul.f32 %v1401_v33, %v1385_v3  ;;  %v939_v32 = vld [vmem:[#allocation5 + $0xc0] sm:$0xff]  ;;  %v940_v33 = vld [vmem:[#allocation5 + $0xc8] sm:$0xff] }
 0x3cf   :  { %v556_v35 = vmul.f32 %v1403_v34, %v1387_v4  ;;  %1336 = vmatprep.subr.bf16.mxu1 %v1335_v31  ;;  %v1339_v34 = vpack.c.bf16 %v940_v33, %v939_v32 }
 0x3d1   :  { %1221 = vmatprep.mubr.msk.f32.mxu0 %vm517_vm2, %v556_v35  ;;  %1338 = vmatpush3.bf16.msra.mxu1 %v1335_v31 }
 0x3d2   :  { %1222 = vmatmul.mubr.msk.f32.gmra.mrb[10].mxu0 %vm517_vm2, %v557_v36  ;;  %1340 = vmatprep.subr.bf16.mxu1 %v1339_v34 }
 0x3d5   :  { %1342 = vmatpush3.bf16.msra.mxu1 %v1339_v34 }
 0x499   :  { %v1214_v43 = vpop.f32.mrb[4].mxu0 }
 0x49a   :  { %v648_v44 = vpop.f32.mrb[5].mxu0  ;;  %v688_v46 = vmul.f32 %v1214_v43, %v1558_v63 }
 0x49b   :  { %v687_v49 = vmul.f32 %v648_v44, %v1552_v55 }
 0x49d   :  { %v1217_v45 = vpop.f32.mrb[6].mxu0 }
 0x49e   :  { %v690_v47 = vmul.f32 %v1217_v45, %v1564_v9  ;;  %v658_v48 = vpop.f32.mrb[7].mxu0 }
 0x49f   :  { %v689_v50 = vmul.f32 %v658_v48, %v1560_v5 }
 0x4a0   :  { %v696_v51 = vadd.f32 %v690_v47, %v688_v46  ;;  %v1086_v46 = vld [vmem:[#allocation5 + $0x1a7] ss:$0 sm:$0xff] }
 0x4a1   :  { %v695_v52 = vadd.f32 %v689_v50, %v687_v49  ;;  %v1220_v53 = vpop.f32.mrb[8].mxu0 }
 0x4a2   :  { %v692_v54 = vmul.f32 %v1220_v53, %v1572_v13  ;;  %v668_v56 = vpop.f32.mrb[9].mxu0 }
 0x4a3   :  { %v691_v57 = vmul.f32 %v668_v56, %v1567_v10  ;;  %v944_v56 = vld [vmem:[#allocation5 + $0xe8] sm:$0xff] }
 0x4a4   :  { %v698_v58 = vadd.f32 %v696_v51, %v692_v54  ;;  %v941_v51 = vld [vmem:[#allocation5 + $0xd0] sm:$0xff]  ;;  %v943_v54 = vld [vmem:[#allocation5 + $0xe0] sm:$0xff] }
 0x4a5   :  { %v697_v59 = vadd.f32 %v695_v52, %v691_v57  ;;  %v1223_v60 = vpop.f32.mrb[10].mxu0  ;;  %v942_v52 = vld [vmem:[#allocation5 + $0xd8] sm:$0xff]  ;;  %v1347_v57 = vpack.c.bf16 %v944_v56, %v943_v54 }
 0x4a6   :  { %v694_v63 = vmul.f32 %v1223_v60, %v1580_v17  ;;  %v678_v61 = vpop.f32.mrb[11].mxu0  ;;  %v1343_v53 = vpack.c.bf16 %v942_v52, %v941_v51 }
 0x4a7   :  { %v693_v9 = vmul.f32 %v678_v61, %v1575_v14  ;;  %v948_v61 = vld [vmem:[#allocation5 + $0x108] sm:$0xff] }
 0x4a8   :  { %v700_v62 = vadd.f32 %v698_v58, %v694_v63  ;;  %1344 = vmatprep.subr.bf16.mxu1 %v1343_v53  ;;  %v945_v58 = vld [vmem:[#allocation5 + $0xf0] sm:$0xff]  ;;  %v947_v63 = vld [vmem:[#allocation5 + $0x100] sm:$0xff] }
 0x4a9   :  { %v699_v55 = vadd.f32 %v697_v59, %v693_v9  ;;  %1346 = vmatpush3.bf16.msra.mxu1 %v1343_v53  ;;  %v946_v59 = vld [vmem:[#allocation5 + $0xf8] sm:$0xff]  ;;  %v1355_v9 = vpack.c.bf16 %v948_v61, %v947_v63 }
 0x4aa   :  { %1348 = vmatprep.subr.bf16.mxu1 %v1347_v57  ;;  %v1351_v60 = vpack.c.bf16 %v946_v59, %v945_v58 }
 0x4ab   :  { %1232 = vmatprep.mubr.msk.f32.mxu0 %vm44_vm0, %v699_v55  ;;  %v950_v55 = vld [vmem:[#allocation5 + $0x118] sm:$0xff] }
 0x4ac   :  { %1233 = vmatmul.mubr.msk.f32.vlgmr.msra.gmra.mrb[12].mxu0 %vm44_vm0, %v700_v62  ;;  %v949_v62 = vld [vmem:[#allocation5 + $0x110] sm:$0xff] }
 0x4ad   :  { %1326 = vmatpush3.bf16.msra.mxu0 %v1323_v22  ;;  %1350 = vmatpush3.bf16.msra.mxu1 %v1347_v57 }
 0x4ae   :  { %1328 = vmatprep.subr.bf16.mxu0 %v1327_v25  ;;  %1352 = vmatprep.subr.bf16.mxu1 %v1351_v60 }
 0x4b1   :  { %1330 = vmatpush3.bf16.msra.mxu0 %v1327_v25  ;;  %1354 = vmatpush3.bf16.msra.mxu1 %v1351_v60 }
 0x4b2   :  { %1356 = vmatprep.subr.bf16.mxu1 %v1355_v9 }
 0x4b5   :  { %1358 = vmatpush3.bf16.msra.mxu1 %v1355_v9 }
 0x57f   :  { %v1234_v5 = vpop.f32.mrb[12].mxu0 }
 0x580   :  { %v787_v13 = vadd.f32 %v1234_v5, %v1536_v1  ;;  %v777_v3 = vpop.f32.mrb[13].mxu0  ;;  %v1359_v5 = vpack.c.bf16 %v950_v55, %v949_v62 }
 0x581   :  { %v786_v10 = vadd.f32 %v777_v3, %v1534_v0 }
 0x582   :  { %v1614_v4 = vadd.f32 %v1084_v2, %v787_v13  ;;  %1360 = vmatprep.subr.bf16.mxu1 %v1359_v5 }
 0x583   :  { %v1616_v6 = vadd.f32 %v1084_v2, %v786_v10  ;;  %1362 = vmatpush3.bf16.msra.mxu1 %v1359_v5  ;;  %v1087_v2 = vld [vmem:[#allocation5 + $0x1a9] ss:$0 sm:$0xff] }
 0x584   :  { %v800_v14 = vsel %vm44_vm0, %v1614_v4, 0.0 }
 0x585   :  { %801 = vadd.xlane.f32.xlu1 %v800_v14  ;;  %v797_v17 = vsel %vm44_vm0, %v1616_v6, 0.0 }
 0x586   :  { %798 = vadd.xlane.f32.xlu0 %v797_v17 }
 0x612   :  { %v802_v7 = vpop.xlane.xlu1 %801 }
 0x613   :  { %v804_v8 = vmul.f32 0.03125, %v802_v7  ;;  %v799_v11 = vpop.xlane.xlu0 %798 }
 0x614   :  { %v803_v12 = vmul.f32 0.03125, %v799_v11 }
 0x615   :  { %v806_v1 = vsub.f32 %v1614_v4, %v804_v8 }
 0x616   :  { %v805_v0 = vsub.f32 %v1616_v6, %v803_v12 }
 0x617   :  { %v808_v15 = vmul.f32 %v806_v1, %v806_v1 }
 0x618   :  { %v807_v16 = vmul.f32 %v805_v0, %v805_v0 }
 0x619   :  { %v812_v18 = vsel %vm44_vm0, %v808_v15, 0.0 }
 0x61a   :  { %813 = vadd.xlane.f32.xlu1 %v812_v18  ;;  %v809_v19 = vsel %vm44_vm0, %v807_v16, 0.0 }
 0x61b   :  { %810 = vadd.xlane.f32.xlu0 %v809_v19  ;;  %v1090_v19 = vld [vmem:[#allocation5 + $0x1a8] ss:$0 sm:$0xff] }
 0x6a7   :  { %v814_v35 = vpop.xlane.xlu1 %813 }
 0x6a8   :  { %v816_v36 = vmul.f32 0.03125, %v814_v35  ;;  %v811_v37 = vpop.xlane.xlu0 %810 }
 0x6a9   :  { %v815_v38 = vmul.f32 0.03125, %v811_v37 }
 0x6aa   :  { %v818_v39 = vadd.f32 1e-05, %v816_v36 }
 0x6ab   :  { %v817_v40 = vadd.f32 1e-05, %v815_v38 }
 0x6ac   :  { %1404 = vrsqrt.f32 %v818_v39 }
 0x6ad   :  { %1406 = vrsqrt.f32 %v817_v40 }
 0x6b6   :  { %v1405_v41 = vpop.eup %1404 }
 0x6b7   :  { %v1407_v43 = vpop.eup %1406  ;;  %v822_v44 = vmul.f32 %v1405_v41, %v806_v1 }
 0x6b8   :  { %v821_v45 = vmul.f32 %v1407_v43, %v805_v0 }
 0x6b9   :  { %v828_v47 = vmul.f32 %v1085_v42, %v822_v44 }
 0x6ba   :  { %v827_v48 = vmul.f32 %v1085_v42, %v821_v45 }
 0x6bb   :  { %v834_v50 = vadd.f32 %v1086_v46, %v828_v47 }
 0x6bc   :  { %v833_v49 = vadd.f32 %v1086_v46, %v827_v48 }
 0x6be   :  { %1243 = vmatprep.mubr.msk.f32.mxu0 %vm44_vm0, %v833_v49 }
 0x6bf   :  { %1244 = vmatmul.mubr.msk.f32.vlgmr.msra.gmra.mrb[14].mxu0 %vm44_vm0, %v834_v50 }
 0x792   :  { %v1245_v13 = vpop.f32.mrb[14].mxu0 }
 0x793   :  { %v922_v3 = vadd.f32 %v1245_v13, %v1087_v2  ;;  %v916_v10 = vpop.f32.mrb[15].mxu0 }
 0x794   :  { %v917_v14 = vadd.f32 %v1087_v2, %v916_v10 }
 0x795   :  { %v928_v17 = vmul.f32 0.70710677, %v922_v3  ;;  %v926_v15 = vmul.f32 0.5, %v922_v3 }
 0x796   :  { %v927_v7 = vmul.f32 0.70710677, %v917_v14  ;;  %v925_v1 = vmul.f32 0.5, %v917_v14 }
 0x797   :  { %1408 = verf.f32 %v928_v17 }
 0x798   :  { %1410 = verf.f32 %v927_v7 }
 0x7a1   :  { %v1409_v8 = vpop.eup %1408 }
 0x7a2   :  { %v1411_v11 = vpop.eup %1410  ;;  %v932_v12 = vadd.f32 1.0, %v1409_v8 }
 0x7a3   :  { %v931_v0 = vadd.f32 1.0, %v1411_v11 }
 0x7a4   :  { %v934_v18 = vmul.f32 %v932_v12, %v926_v15 }
 0x7a5   :  { %v933_v16 = vmul.f32 %v931_v0, %v925_v1 }
 0x7a7   :  { %1278 = vmatprep.mubr.f32.mxu1 %v933_v16 }
 0x7a8   :  { %1279 = vmatmul.mubr.f32.vlgmr.msra.gmra.mrb[10].mxu1 %v934_v18 }
 0x87b   :  { %v1280_v20 = vpop.f32.mrb[10].mxu1 }
 0x87c   :  { %v1028_v21 = vadd.f32 %v1280_v20, %v1090_v19  ;;  %v1022_v22 = vpop.f32.mrb[11].mxu1 }
 0x87d   :  { %v1023_v23 = vadd.f32 %v1090_v19, %v1022_v22 }
 0x87e   :  { %v1032_v24 = vadd.f32 %v1028_v21, %v1614_v4 }
 0x87f   :  { %v1031_v25 = vadd.f32 %v1023_v23, %v1616_v6 }
 0x880   :  { %1034 = vst.msk [vmem:[#allocation7 + $0x8] sm:$0xff] %vm44_vm0, %v1032_v24 }
 0x881   :  { %1033 = vst.msk [vmem:[#allocation7] sm:$0xff] %vm44_vm0, %v1031_v25 }
 0x882   :  { %1467 = shalt.err (!%p1464_p6)
}
 0x883   :  { %s1468_s10 = scalar_lea.hbm %s1649_s2, 256 }
 0x884   :  { %p1469_p7 = scmp.ne.s32.totalorder %s1649_s2, %s1468_s10  ;;  %p1472_p8 = scmp.lt.u32.totalorder %s1468_s10, %s1649_s2 }
 0x886   :  { %p1474_p9 = pnand %p1472_p8, %p1469_p7 }
 0x888   :  { %1477 = shalt.err (!%p1474_p9)
}
 0x889   :  { %1046 = dma.vmem_to_hbm [thread:$0]  %s1041_s6, 256, %s1649_s2, [#allocation4], %s1485_s19, %s1485_s19, %s1486_s20  }
 0x88a   :  { %1482 = dma.done.wait [#allocation4], 256  }
 0x88b   :  { %1483 = vsyncadd [#allocation4], 4294967040 }
 0x88c   :  { %1050 = vsyncpa [#allocation3], 1 }
 0x88d   :  { %1051 = vsyncpa [#allocation6], 1 }
 0x88e   :  { %1052 = vsyncpa [#allocation4], 1 }

</bundles_post_ra>
